<compile_context>
chip_gen: v7x
topology: tpu7x:2x2x1
jax: 0.10.0
libtpu: 0.0.40
codegen_flags: <defaults>
</compile_context>

<pallas_src>
import functools
import math

import jax
import jax.numpy as jnp
from jax.experimental import pallas as pl
from jax.experimental.pallas import tpu as pltpu

# ----------------------------- model config ---------------------------------
B = 2          # batch
S = 8          # sequence length
D = 32         # d_model
H = 4          # num heads
DH = D // H    # head dim
DFF = 64       # feed-forward dim
NUM_LAYERS = 2
EPS = 1e-5
NEG_INF = -1e30


# ------------------------------ Pallas kernel -------------------------------
def encoder_stack_kernel(x_ref, hmask_ref, bmask_ref,
                         wattn_ref, w1_ref, w2_ref, vec_ref,
                         o_ref, *, num_heads, d_model, d_ff):
    """One grid step == one encoder layer; activation carried in o_ref (VMEM)."""
    layer = pl.program_id(0)
    d = d_model
    bf16 = jnp.bfloat16

    # Load the input once; afterwards the (constant-index, VMEM-resident)
    # output block itself carries the activation between layers.
    @pl.when(layer == 0)
    def _():
        o_ref[...] = x_ref[...]

    x2 = o_ref[...]                                   # (BS, D) float32
    bs = x2.shape[0]

    # ---- unpack bias / LayerNorm vector slab (one DMA, f32) ----
    bq = vec_ref[0:1, 0:d]
    bk = vec_ref[1:2, 0:d]
    bv = vec_ref[2:3, 0:d]
    bo = vec_ref[3:4, 0:d]
    b1 = vec_ref[4:5, 0:d_ff]
    b2 = vec_ref[5:6, 0:d]
    g1 = vec_ref[6:7, 0:d]
    be1 = vec_ref[7:8, 0:d]
    g2 = vec_ref[8:9, 0:d]
    be2 = vec_ref[9:10, 0:d]

    # ---- Q/K/V projections: bf16 MXU operands, f32 accumulation ----
    # (1/sqrt(dh) already folded into wq / bq host-side.)
    x2b = x2.astype(bf16)
    q = jnp.dot(x2b, wattn_ref[0 * d:1 * d, :],
                preferred_element_type=jnp.float32) + bq
    k = jnp.dot(x2b, wattn_ref[1 * d:2 * d, :],
                preferred_element_type=jnp.float32) + bk
    v = jnp.dot(x2b, wattn_ref[2 * d:3 * d, :],
                preferred_element_type=jnp.float32) + bv

    # ---- multi-head attention: mask Q per head, flatten heads into rows ----
    hmask = hmask_ref[...]                                      # (H, 1, D) f32
    qh = (q[None, :, :] * hmask).reshape(num_heads * bs, d)     # (H*BS, D) f32

    # scores: (H*BS, D) x (BS, D)^T -> (H*BS, BS)
    s = jax.lax.dot_general(qh.astype(bf16), k.astype(bf16),
                            (((1,), (1,)), ((), ())),
                            preferred_element_type=jnp.float32)
    s = s + bmask_ref[...]                 # block-diagonal batch mask (0 / -1e30)
    s = s - jnp.max(s, axis=-1, keepdims=True)
    p = jnp.exp(s)
    p = p * pl.reciprocal(jnp.sum(p, axis=-1, keepdims=True), approx=True)

    # context: (H*BS, BS) x (BS, D) -> (H*BS, D); per-head columns selected by
    # mask-and-sum over the head axis (heads occupy disjoint columns).
    c = jnp.dot(p.astype(bf16), v.astype(bf16),
                preferred_element_type=jnp.float32)
    ctx = (c.reshape(num_heads, bs, d) * hmask).sum(axis=0)     # (BS, D)

    attn = jnp.dot(ctx.astype(bf16), wattn_ref[3 * d:4 * d, :],
                   preferred_element_type=jnp.float32) + bo

    # ---- residual + LayerNorm 1 (post-norm, biased variance, f32) ----
    y = x2 + attn
    mu = jnp.mean(y, axis=-1, keepdims=True)
    var = jnp.mean((y - mu) * (y - mu), axis=-1, keepdims=True)
    y = (y - mu) * jax.lax.rsqrt(var + EPS) * g1 + be1

    # ---- feed-forward (ReLU), bf16 MXU operands ----
    h1 = jnp.dot(y.astype(bf16), w1_ref[...],
                 preferred_element_type=jnp.float32) + b1
    h1 = jnp.maximum(h1, 0.0)
    h2 = jnp.dot(h1.astype(bf16), w2_ref[...],
                 preferred_element_type=jnp.float32) + b2

    # ---- residual + LayerNorm 2 ----
    z = y + h2
    mu2 = jnp.mean(z, axis=-1, keepdims=True)
    var2 = jnp.mean((z - mu2) * (z - mu2), axis=-1, keepdims=True)
    z = (z - mu2) * jax.lax.rsqrt(var2 + EPS) * g2 + be2

    o_ref[...] = z                          # carried to next layer; flushed at end


# ------------------------------ wrapper --------------------------------------
def transformer_encoder(x, all_params, num_heads=H):
    """Apply the full encoder stack to x of shape (B, S, D) in one pallas_call."""
    bsz, seq, d = x.shape
    num_layers = len(all_params)
    dff = all_params[0]["w1"].shape[1]
    dh = d // num_heads
    scale = 1.0 / math.sqrt(dh)
    bs = bsz * seq
    vw = max(d, dff)                       # lane width of the bias/LN slab

    # ---- pack per-layer params into 4 slabs (fewer DMA descriptors/layer) ----
    wattn = jnp.stack([
        jnp.concatenate([p["wq"] * scale, p["wk"], p["wv"], p["wo"]], axis=0)
        for p in all_params]).astype(jnp.bfloat16)                 # (L, 4D, D)
    w1 = jnp.stack([p["w1"] for p in all_params]).astype(jnp.bfloat16)  # (L, D, DFF)
    w2 = jnp.stack([p["w2"] for p in all_params]).astype(jnp.bfloat16)  # (L, DFF, D)

    def row(vec):                          # (1, n) -> (1, vw), zero-padded
        return jnp.pad(vec, ((0, 0), (0, vw - vec.shape[1])))

    vecs = jnp.stack([
        jnp.concatenate([row(p["bq"] * scale), row(p["bk"]), row(p["bv"]),
                         row(p["bo"]), row(p["b1"]), row(p["b2"]),
                         row(p["g1"]), row(p["be1"]), row(p["g2"]), row(p["be2"])],
                        axis=0)
        for p in all_params]).astype(jnp.float32)                  # (L, 10, vw)

    # ---- host-side constant masks (DMA'd once; constant index_map) ----
    lane = jnp.arange(d)
    hmask = (lane[None, None, :] // dh ==
             jnp.arange(num_heads)[:, None, None]).astype(jnp.float32)   # (H, 1, D)
    bids = jnp.repeat(jnp.arange(bsz), seq)
    bmask = jnp.where(bids[:, None] == bids[None, :], 0.0, NEG_INF)
    bmask = jnp.tile(bmask, (num_heads, 1)).astype(jnp.float32)          # (H*BS, BS)

    x_flat = x.reshape(bs, d).astype(jnp.float32)

    def const_spec(shape):
        nd = len(shape)
        return pl.BlockSpec(tuple(shape), lambda l, _n=nd: (0,) * _n)

    def layer_spec(shape):
        nd = len(shape)
        return pl.BlockSpec((pl.Squeezed(),) + tuple(shape),
                            lambda l, _n=nd: (l,) + (0,) * _n)

    kernel = functools.partial(encoder_stack_kernel,
                               num_heads=num_heads, d_model=d, d_ff=dff)

    out_flat = pl.pallas_call(
        kernel,
        out_shape=jax.ShapeDtypeStruct((bs, d), jnp.float32),
        grid_spec=pltpu.PrefetchScalarGridSpec(
            num_scalar_prefetch=0,
            grid=(num_layers,),
            in_specs=[
                const_spec((bs, d)),                  # x (read at layer 0)
                const_spec((num_heads, 1, d)),        # head lane mask
                const_spec((num_heads * bs, bs)),     # batch block-diag mask (tiled over heads)
                layer_spec((4 * d, d)),               # [wq; wk; wv; wo]  bf16
                layer_spec((d, dff)),                 # w1                bf16
                layer_spec((dff, d)),                 # w2                bf16
                layer_spec((10, vw)),                 # biases + LN params f32
            ],
            out_specs=const_spec((bs, d)),
        ),
        compiler_params=pltpu.CompilerParams(
            dimension_semantics=("arbitrary",)),
    )(x_flat, hmask, bmask, wattn, w1, w2, vecs)

    return out_flat.reshape(bsz, seq, d)


# --------------------------- parameter init ----------------------------------
def init_layer_params(key):
    ks = jax.random.split(key, 8)

    def lin(k, fan_in, fan_out):
        bound = 1.0 / math.sqrt(fan_in)
        return jax.random.uniform(k, (fan_in, fan_out), jnp.float32, -bound, bound)

    return {
        "wq": lin(ks[0], D, D),   "bq": jnp.zeros((1, D), jnp.float32),
        "wk": lin(ks[1], D, D),   "bk": jnp.zeros((1, D), jnp.float32),
        "wv": lin(ks[2], D, D),   "bv": jnp.zeros((1, D), jnp.float32),
        "wo": lin(ks[3], D, D),   "bo": jnp.zeros((1, D), jnp.float32),
        "w1": lin(ks[4], D, DFF), "b1": jnp.zeros((1, DFF), jnp.float32),
        "w2": lin(ks[5], DFF, D), "b2": jnp.zeros((1, D), jnp.float32),
        "g1": jnp.ones((1, D), jnp.float32), "be1": jnp.zeros((1, D), jnp.float32),
        "g2": jnp.ones((1, D), jnp.float32), "be2": jnp.zeros((1, D), jnp.float32),
    }


# --------------------------------- main ---------------------------------------
if __name__ == "__main__":
    root = jax.random.PRNGKey(0)
    kx, kp = jax.random.split(root)

    x = jax.random.normal(kx, (B, S, D), dtype=jnp.float32)

    layer_keys = jax.random.split(kp, NUM_LAYERS)
    all_params = [init_layer_params(k) for k in layer_keys]

    out = transformer_encoder(x, all_params)
    out = jax.block_until_ready(out)

    assert out.shape == (B, S, D) and out.dtype == jnp.float32
    assert bool(jnp.all(jnp.isfinite(out)))
    print("KERNEL_OK")
</pallas_src>

<mosaic_0001>
module attributes {stable_mosaic.version = 11 : i64} {
  func.func @encoder_stack_kernel(%arg0: i32, %arg1: memref<16x32xf32, #tpu.memory_space<vmem>>, %arg2: memref<4x1x32xf32, #tpu.memory_space<vmem>>, %arg3: memref<64x16xf32, #tpu.memory_space<vmem>>, %arg4: memref<1x128x32xbf16, #tpu.memory_space<vmem>>, %arg5: memref<1x32x64xbf16, #tpu.memory_space<vmem>>, %arg6: memref<1x64x32xbf16, #tpu.memory_space<vmem>>, %arg7: memref<1x10x64xf32, #tpu.memory_space<vmem>>, %arg8: memref<16x32xf32, #tpu.memory_space<vmem>>) attributes {dimension_semantics = [#tpu.dimension_semantics<arbitrary>], iteration_bounds = array<i64: 2>, scalar_prefetch = 0 : i64, scratch_operands = 0 : i64, tpu.core_type = #tpu.core_type<tc>, window_params = [{pipeline_mode = #tpu.pipeline_mode<synchronous>, transform_indices = @transform_0, window_bounds = array<i64: 16, 32>}, {pipeline_mode = #tpu.pipeline_mode<synchronous>, transform_indices = @transform_1, window_bounds = array<i64: 4, 1, 32>}, {pipeline_mode = #tpu.pipeline_mode<synchronous>, transform_indices = @transform_2, window_bounds = array<i64: 64, 16>}, {transform_indices = @transform_3, window_bounds = array<i64: 1, 128, 32>}, {transform_indices = @transform_4, window_bounds = array<i64: 1, 32, 64>}, {transform_indices = @transform_5, window_bounds = array<i64: 1, 64, 32>}, {transform_indices = @transform_6, window_bounds = array<i64: 1, 10, 64>}, {pipeline_mode = #tpu.pipeline_mode<synchronous>, transform_indices = @transform_7, window_bounds = array<i64: 16, 32>}]} {
    %c0_i32 = arith.constant 0 : i32
    %0 = arith.cmpi eq, %arg0, %c0_i32 : i32
    %1 = arith.extui %0 : i1 to i32
    %c0_i32_0 = arith.constant 0 : i32
    %2 = arith.cmpi ne, %1, %c0_i32_0 : i32
    scf.if %2 {
      %c0_66 = arith.constant 0 : index
      %c0_67 = arith.constant 0 : index
      %139 = vector.load %arg1[%c0_66, %c0_67] : memref<16x32xf32, #tpu.memory_space<vmem>>, vector<16x32xf32>
      %c0_68 = arith.constant 0 : index
      %c0_69 = arith.constant 0 : index
      %140 = vector.load %arg8[%c0_68, %c0_69] : memref<16x32xf32, #tpu.memory_space<vmem>>, vector<16x32xf32>
      tpu.vector_store %arg8[%c0_68, %c0_69], %139 {strides = array<i32>} : memref<16x32xf32, #tpu.memory_space<vmem>>, vector<16x32xf32>,
    } else {
    }
    %c0 = arith.constant 0 : index
    %c0_1 = arith.constant 0 : index
    %3 = vector.load %arg8[%c0, %c0_1] : memref<16x32xf32, #tpu.memory_space<vmem>>, vector<16x32xf32>
    %c0_2 = arith.constant 0 : index
    %c0_3 = arith.constant 0 : index
    %c0_4 = arith.constant 0 : index
    %4 = vector.load %arg7[%c0_2, %c0_3, %c0_4] : memref<1x10x64xf32, #tpu.memory_space<vmem>>, vector<1x1x32xf32>
    %5 = vector.shape_cast %4 : vector<1x1x32xf32> to vector<1x32xf32>
    %c0_5 = arith.constant 0 : index
    %c1 = arith.constant 1 : index
    %c0_6 = arith.constant 0 : index
    %6 = vector.load %arg7[%c0_5, %c1, %c0_6] : memref<1x10x64xf32, #tpu.memory_space<vmem>>, vector<1x1x32xf32>
    %7 = vector.shape_cast %6 : vector<1x1x32xf32> to vector<1x32xf32>
    %c0_7 = arith.constant 0 : index
    %c2 = arith.constant 2 : index
    %c0_8 = arith.constant 0 : index
    %8 = vector.load %arg7[%c0_7, %c2, %c0_8] : memref<1x10x64xf32, #tpu.memory_space<vmem>>, vector<1x1x32xf32>
    %9 = vector.shape_cast %8 : vector<1x1x32xf32> to vector<1x32xf32>
    %c0_9 = arith.constant 0 : index
    %c3 = arith.constant 3 : index
    %c0_10 = arith.constant 0 : index
    %10 = vector.load %arg7[%c0_9, %c3, %c0_10] : memref<1x10x64xf32, #tpu.memory_space<vmem>>, vector<1x1x32xf32>
    %11 = vector.shape_cast %10 : vector<1x1x32xf32> to vector<1x32xf32>
    %c0_11 = arith.constant 0 : index
    %c4 = arith.constant 4 : index
    %c0_12 = arith.constant 0 : index
    %12 = vector.load %arg7[%c0_11, %c4, %c0_12] : memref<1x10x64xf32, #tpu.memory_space<vmem>>, vector<1x1x64xf32>
    %13 = vector.shape_cast %12 : vector<1x1x64xf32> to vector<1x64xf32>
    %c0_13 = arith.constant 0 : index
    %c5 = arith.constant 5 : index
    %c0_14 = arith.constant 0 : index
    %14 = vector.load %arg7[%c0_13, %c5, %c0_14] : memref<1x10x64xf32, #tpu.memory_space<vmem>>, vector<1x1x32xf32>
    %15 = vector.shape_cast %14 : vector<1x1x32xf32> to vector<1x32xf32>
    %c0_15 = arith.constant 0 : index
    %c6 = arith.constant 6 : index
    %c0_16 = arith.constant 0 : index
    %16 = vector.load %arg7[%c0_15, %c6, %c0_16] : memref<1x10x64xf32, #tpu.memory_space<vmem>>, vector<1x1x32xf32>
    %17 = vector.shape_cast %16 : vector<1x1x32xf32> to vector<1x32xf32>
    %c0_17 = arith.constant 0 : index
    %c7 = arith.constant 7 : index
    %c0_18 = arith.constant 0 : index
    %18 = vector.load %arg7[%c0_17, %c7, %c0_18] : memref<1x10x64xf32, #tpu.memory_space<vmem>>, vector<1x1x32xf32>
    %19 = vector.shape_cast %18 : vector<1x1x32xf32> to vector<1x32xf32>
    %c0_19 = arith.constant 0 : index
    %c8 = arith.constant 8 : index
    %c0_20 = arith.constant 0 : index
    %20 = vector.load %arg7[%c0_19, %c8, %c0_20] : memref<1x10x64xf32, #tpu.memory_space<vmem>>, vector<1x1x32xf32>
    %21 = vector.shape_cast %20 : vector<1x1x32xf32> to vector<1x32xf32>
    %c0_21 = arith.constant 0 : index
    %c9 = arith.constant 9 : index
    %c0_22 = arith.constant 0 : index
    %22 = vector.load %arg7[%c0_21, %c9, %c0_22] : memref<1x10x64xf32, #tpu.memory_space<vmem>>, vector<1x1x32xf32>
    %23 = vector.shape_cast %22 : vector<1x1x32xf32> to vector<1x32xf32>
    %24 = arith.truncf %3 : vector<16x32xf32> to vector<16x32xbf16>
    %c0_23 = arith.constant 0 : index
    %c0_24 = arith.constant 0 : index
    %c0_25 = arith.constant 0 : index
    %25 = vector.load %arg4[%c0_23, %c0_24, %c0_25] : memref<1x128x32xbf16, #tpu.memory_space<vmem>>, vector<1x32x32xbf16>
    %26 = vector.shape_cast %25 : vector<1x32x32xbf16> to vector<32x32xbf16>
    %cst = arith.constant dense<0.000000e+00> : vector<16x32xf32>
    %27 = tpu.matmul %24, %26, %cst {dimension_numbers = #tpu.dot_dimension_numbers<[1], [0], [0], [1], [0, 0, 1, 1], [], []>} : vector<16x32xbf16>, vector<32x32xbf16>, vector<16x32xf32> -> vector<16x32xf32>
    %28 = vector.broadcast %5 : vector<1x32xf32> to vector<16x32xf32>
    %29 = arith.addf %27, %28 : vector<16x32xf32>
    %c0_26 = arith.constant 0 : index
    %c32 = arith.constant 32 : index
    %c0_27 = arith.constant 0 : index
    %30 = vector.load %arg4[%c0_26, %c32, %c0_27] : memref<1x128x32xbf16, #tpu.memory_space<vmem>>, vector<1x32x32xbf16>
    %31 = vector.shape_cast %30 : vector<1x32x32xbf16> to vector<32x32xbf16>
    %cst_28 = arith.constant dense<0.000000e+00> : vector<16x32xf32>
    %32 = tpu.matmul %24, %31, %cst_28 {dimension_numbers = #tpu.dot_dimension_numbers<[1], [0], [0], [1], [0, 0, 1, 1], [], []>} : vector<16x32xbf16>, vector<32x32xbf16>, vector<16x32xf32> -> vector<16x32xf32>
    %33 = vector.broadcast %7 : vector<1x32xf32> to vector<16x32xf32>
    %34 = arith.addf %32, %33 : vector<16x32xf32>
    %c0_29 = arith.constant 0 : index
    %c64 = arith.constant 64 : index
    %c0_30 = arith.constant 0 : index
    %35 = vector.load %arg4[%c0_29, %c64, %c0_30] : memref<1x128x32xbf16, #tpu.memory_space<vmem>>, vector<1x32x32xbf16>
    %36 = vector.shape_cast %35 : vector<1x32x32xbf16> to vector<32x32xbf16>
    %cst_31 = arith.constant dense<0.000000e+00> : vector<16x32xf32>
    %37 = tpu.matmul %24, %36, %cst_31 {dimension_numbers = #tpu.dot_dimension_numbers<[1], [0], [0], [1], [0, 0, 1, 1], [], []>} : vector<16x32xbf16>, vector<32x32xbf16>, vector<16x32xf32> -> vector<16x32xf32>
    %38 = vector.broadcast %9 : vector<1x32xf32> to vector<16x32xf32>
    %39 = arith.addf %37, %38 : vector<16x32xf32>
    %c0_32 = arith.constant 0 : index
    %c0_33 = arith.constant 0 : index
    %c0_34 = arith.constant 0 : index
    %40 = vector.load %arg2[%c0_32, %c0_33, %c0_34] : memref<4x1x32xf32, #tpu.memory_space<vmem>>, vector<4x1x32xf32>
    %41 = vector.shape_cast %29 : vector<16x32xf32> to vector<1x16x32xf32>
    %42 = vector.broadcast %41 : vector<1x16x32xf32> to vector<4x16x32xf32>
    %43 = vector.broadcast %40 : vector<4x1x32xf32> to vector<4x16x32xf32>
    %44 = arith.mulf %42, %43 : vector<4x16x32xf32>
    %45 = vector.shape_cast %44 : vector<4x16x32xf32> to vector<64x32xf32>
    %46 = arith.truncf %45 : vector<64x32xf32> to vector<64x32xbf16>
    %47 = arith.truncf %34 : vector<16x32xf32> to vector<16x32xbf16>
    %cst_35 = arith.constant dense<0.000000e+00> : vector<64x16xf32>
    %48 = tpu.matmul %46, %47, %cst_35 {dimension_numbers = #tpu.dot_dimension_numbers<[1], [1], [0], [0], [0, 0, 1, 0], [], []>} : vector<64x32xbf16>, vector<16x32xbf16>, vector<64x16xf32> -> vector<64x16xf32>
    %c0_36 = arith.constant 0 : index
    %c0_37 = arith.constant 0 : index
    %49 = vector.load %arg3[%c0_36, %c0_37] : memref<64x16xf32, #tpu.memory_space<vmem>>, vector<64x16xf32>
    %50 = arith.addf %48, %49 : vector<64x16xf32>
    %cst_38 = arith.constant dense<0xFF800000> : vector<64xf32>
    %51 = vector.multi_reduction <maximumf>, %50, %cst_38 [1] : vector<64x16xf32> to vector<64xf32>
    %52 = vector.shape_cast %51 : vector<64xf32> to vector<64x1xf32>
    %53 = vector.broadcast %52 : vector<64x1xf32> to vector<64x16xf32>
    %54 = arith.subf %50, %53 : vector<64x16xf32>
    %55 = math.exp %54 : vector<64x16xf32>
    %cst_39 = arith.constant dense<0.000000e+00> : vector<64xf32>
    %56 = vector.multi_reduction <add>, %55, %cst_39 [1] : vector<64x16xf32> to vector<64xf32>
    %57 = vector.shape_cast %56 : vector<64xf32> to vector<64x1xf32>
    %58 = tpu.reciprocal %57 {approx = true} : vector<64x1xf32> -> vector<64x1xf32>
    %59 = vector.broadcast %58 : vector<64x1xf32> to vector<64x16xf32>
    %60 = arith.mulf %55, %59 : vector<64x16xf32>
    %61 = arith.truncf %60 : vector<64x16xf32> to vector<64x16xbf16>
    %62 = arith.truncf %39 : vector<16x32xf32> to vector<16x32xbf16>
    %cst_40 = arith.constant dense<0.000000e+00> : vector<64x32xf32>
    %63 = tpu.matmul %61, %62, %cst_40 {dimension_numbers = #tpu.dot_dimension_numbers<[1], [0], [0], [1], [0, 0, 1, 1], [], []>} : vector<64x16xbf16>, vector<16x32xbf16>, vector<64x32xf32> -> vector<64x32xf32>
    %64 = vector.shape_cast %63 : vector<64x32xf32> to vector<4x16x32xf32>
    %65 = vector.broadcast %40 : vector<4x1x32xf32> to vector<4x16x32xf32>
    %66 = arith.mulf %64, %65 : vector<4x16x32xf32>
    %cst_41 = arith.constant dense<0.000000e+00> : vector<16x32xf32>
    %67 = vector.multi_reduction <add>, %66, %cst_41 [0] : vector<4x16x32xf32> to vector<16x32xf32>
    %68 = arith.truncf %67 : vector<16x32xf32> to vector<16x32xbf16>
    %c0_42 = arith.constant 0 : index
    %c96 = arith.constant 96 : index
    %c0_43 = arith.constant 0 : index
    %69 = vector.load %arg4[%c0_42, %c96, %c0_43] : memref<1x128x32xbf16, #tpu.memory_space<vmem>>, vector<1x32x32xbf16>
    %70 = vector.shape_cast %69 : vector<1x32x32xbf16> to vector<32x32xbf16>
    %cst_44 = arith.constant dense<0.000000e+00> : vector<16x32xf32>
    %71 = tpu.matmul %68, %70, %cst_44 {dimension_numbers = #tpu.dot_dimension_numbers<[1], [0], [0], [1], [0, 0, 1, 1], [], []>} : vector<16x32xbf16>, vector<32x32xbf16>, vector<16x32xf32> -> vector<16x32xf32>
    %72 = vector.broadcast %11 : vector<1x32xf32> to vector<16x32xf32>
    %73 = arith.addf %71, %72 : vector<16x32xf32>
    %74 = arith.addf %3, %73 : vector<16x32xf32>
    %cst_45 = arith.constant dense<0.000000e+00> : vector<16xf32>
    %75 = vector.multi_reduction <add>, %74, %cst_45 [1] : vector<16x32xf32> to vector<16xf32>
    %76 = vector.shape_cast %75 : vector<16xf32> to vector<16x1xf32>
    %cst_46 = arith.constant 3.200000e+01 : f32
    %77 = vector.broadcast %cst_46 : f32 to vector<16x1xf32>
    %78 = arith.divf %76, %77 : vector<16x1xf32>
    %79 = vector.broadcast %78 : vector<16x1xf32> to vector<16x32xf32>
    %80 = arith.subf %74, %79 : vector<16x32xf32>
    %81 = vector.broadcast %78 : vector<16x1xf32> to vector<16x32xf32>
    %82 = arith.subf %74, %81 : vector<16x32xf32>
    %83 = arith.mulf %80, %82 : vector<16x32xf32>
    %cst_47 = arith.constant dense<0.000000e+00> : vector<16xf32>
    %84 = vector.multi_reduction <add>, %83, %cst_47 [1] : vector<16x32xf32> to vector<16xf32>
    %85 = vector.shape_cast %84 : vector<16xf32> to vector<16x1xf32>
    %cst_48 = arith.constant 3.200000e+01 : f32
    %86 = vector.broadcast %cst_48 : f32 to vector<16x1xf32>
    %87 = arith.divf %85, %86 : vector<16x1xf32>
    %88 = vector.broadcast %78 : vector<16x1xf32> to vector<16x32xf32>
    %89 = arith.subf %74, %88 : vector<16x32xf32>
    %cst_49 = arith.constant 9.99999974E-6 : f32
    %90 = vector.broadcast %cst_49 : f32 to vector<16x1xf32>
    %91 = arith.addf %87, %90 : vector<16x1xf32>
    %92 = math.rsqrt %91 : vector<16x1xf32>
    %93 = vector.broadcast %92 : vector<16x1xf32> to vector<16x32xf32>
    %94 = arith.mulf %89, %93 : vector<16x32xf32>
    %95 = vector.broadcast %17 : vector<1x32xf32> to vector<16x32xf32>
    %96 = arith.mulf %94, %95 : vector<16x32xf32>
    %97 = vector.broadcast %19 : vector<1x32xf32> to vector<16x32xf32>
    %98 = arith.addf %96, %97 : vector<16x32xf32>
    %99 = arith.truncf %98 : vector<16x32xf32> to vector<16x32xbf16>
    %c0_50 = arith.constant 0 : index
    %c0_51 = arith.constant 0 : index
    %c0_52 = arith.constant 0 : index
    %100 = vector.load %arg5[%c0_50, %c0_51, %c0_52] : memref<1x32x64xbf16, #tpu.memory_space<vmem>>, vector<1x32x64xbf16>
    %101 = vector.shape_cast %100 : vector<1x32x64xbf16> to vector<32x64xbf16>
    %cst_53 = arith.constant dense<0.000000e+00> : vector<16x64xf32>
    %102 = tpu.matmul %99, %101, %cst_53 {dimension_numbers = #tpu.dot_dimension_numbers<[1], [0], [0], [1], [0, 0, 1, 1], [], []>} : vector<16x32xbf16>, vector<32x64xbf16>, vector<16x64xf32> -> vector<16x64xf32>
    %103 = vector.broadcast %13 : vector<1x64xf32> to vector<16x64xf32>
    %104 = arith.addf %102, %103 : vector<16x64xf32>
    %cst_54 = arith.constant 0.000000e+00 : f32
    %105 = vector.broadcast %cst_54 : f32 to vector<16x64xf32>
    %106 = arith.maximumf %104, %105 : vector<16x64xf32>
    %107 = arith.truncf %106 : vector<16x64xf32> to vector<16x64xbf16>
    %c0_55 = arith.constant 0 : index
    %c0_56 = arith.constant 0 : index
    %c0_57 = arith.constant 0 : index
    %108 = vector.load %arg6[%c0_55, %c0_56, %c0_57] : memref<1x64x32xbf16, #tpu.memory_space<vmem>>, vector<1x64x32xbf16>
    %109 = vector.shape_cast %108 : vector<1x64x32xbf16> to vector<64x32xbf16>
    %cst_58 = arith.constant dense<0.000000e+00> : vector<16x32xf32>
    %110 = tpu.matmul %107, %109, %cst_58 {dimension_numbers = #tpu.dot_dimension_numbers<[1], [0], [0], [1], [0, 0, 1, 1], [], []>} : vector<16x64xbf16>, vector<64x32xbf16>, vector<16x32xf32> -> vector<16x32xf32>
    %111 = vector.broadcast %15 : vector<1x32xf32> to vector<16x32xf32>
    %112 = arith.addf %110, %111 : vector<16x32xf32>
    %113 = arith.addf %98, %112 : vector<16x32xf32>
    %cst_59 = arith.constant dense<0.000000e+00> : vector<16xf32>
    %114 = vector.multi_reduction <add>, %113, %cst_59 [1] : vector<16x32xf32> to vector<16xf32>
    %115 = vector.shape_cast %114 : vector<16xf32> to vector<16x1xf32>
    %cst_60 = arith.constant 3.200000e+01 : f32
    %116 = vector.broadcast %cst_60 : f32 to vector<16x1xf32>
    %117 = arith.divf %115, %116 : vector<16x1xf32>
    %118 = vector.broadcast %117 : vector<16x1xf32> to vector<16x32xf32>
    %119 = arith.subf %113, %118 : vector<16x32xf32>
    %120 = vector.broadcast %117 : vector<16x1xf32> to vector<16x32xf32>
    %121 = arith.subf %113, %120 : vector<16x32xf32>
    %122 = arith.mulf %119, %121 : vector<16x32xf32>
    %cst_61 = arith.constant dense<0.000000e+00> : vector<16xf32>
    %123 = vector.multi_reduction <add>, %122, %cst_61 [1] : vector<16x32xf32> to vector<16xf32>
    %124 = vector.shape_cast %123 : vector<16xf32> to vector<16x1xf32>
    %cst_62 = arith.constant 3.200000e+01 : f32
    %125 = vector.broadcast %cst_62 : f32 to vector<16x1xf32>
    %126 = arith.divf %124, %125 : vector<16x1xf32>
    %127 = vector.broadcast %117 : vector<16x1xf32> to vector<16x32xf32>
    %128 = arith.subf %113, %127 : vector<16x32xf32>
    %cst_63 = arith.constant 9.99999974E-6 : f32
    %129 = vector.broadcast %cst_63 : f32 to vector<16x1xf32>
    %130 = arith.addf %126, %129 : vector<16x1xf32>
    %131 = math.rsqrt %130 : vector<16x1xf32>
    %132 = vector.broadcast %131 : vector<16x1xf32> to vector<16x32xf32>
    %133 = arith.mulf %128, %132 : vector<16x32xf32>
    %134 = vector.broadcast %21 : vector<1x32xf32> to vector<16x32xf32>
    %135 = arith.mulf %133, %134 : vector<16x32xf32>
    %136 = vector.broadcast %23 : vector<1x32xf32> to vector<16x32xf32>
    %137 = arith.addf %135, %136 : vector<16x32xf32>
    %c0_64 = arith.constant 0 : index
    %c0_65 = arith.constant 0 : index
    %138 = vector.load %arg8[%c0_64, %c0_65] : memref<16x32xf32, #tpu.memory_space<vmem>>, vector<16x32xf32>
    tpu.vector_store %arg8[%c0_64, %c0_65], %137 {strides = array<i32>} : memref<16x32xf32, #tpu.memory_space<vmem>>, vector<16x32xf32>,
    return
  }
  func.func @transform_0(%arg0: i32) -> (i32, i32) {
    %c0_i32 = arith.constant 0 : i32
    %c0_i32_0 = arith.constant 0 : i32
    %c0_i32_1 = arith.constant 0 : i32
    return %c0_i32, %c0_i32_0 : i32, i32
  }
  func.func @transform_1(%arg0: i32) -> (i32, i32, i32) {
    %c0_i32 = arith.constant 0 : i32
    %c0_i32_0 = arith.constant 0 : i32
    %c0_i32_1 = arith.constant 0 : i32
    %c0_i32_2 = arith.constant 0 : i32
    return %c0_i32, %c0_i32_0, %c0_i32_1 : i32, i32, i32
  }
  func.func @transform_2(%arg0: i32) -> (i32, i32) {
    %c0_i32 = arith.constant 0 : i32
    %c0_i32_0 = arith.constant 0 : i32
    %c0_i32_1 = arith.constant 0 : i32
    return %c0_i32, %c0_i32_0 : i32, i32
  }
  func.func @transform_3(%arg0: i32) -> (i32, i32, i32) {
    %c0_i32 = arith.constant 0 : i32
    %c0_i32_0 = arith.constant 0 : i32
    %c0_i32_1 = arith.constant 0 : i32
    return %arg0, %c0_i32, %c0_i32_0 : i32, i32, i32
  }
  func.func @transform_4(%arg0: i32) -> (i32, i32, i32) {
    %c0_i32 = arith.constant 0 : i32
    %c0_i32_0 = arith.constant 0 : i32
    %c0_i32_1 = arith.constant 0 : i32
    return %arg0, %c0_i32, %c0_i32_0 : i32, i32, i32
  }
  func.func @transform_5(%arg0: i32) -> (i32, i32, i32) {
    %c0_i32 = arith.constant 0 : i32
    %c0_i32_0 = arith.constant 0 : i32
    %c0_i32_1 = arith.constant 0 : i32
    return %arg0, %c0_i32, %c0_i32_0 : i32, i32, i32
  }
  func.func @transform_6(%arg0: i32) -> (i32, i32, i32) {
    %c0_i32 = arith.constant 0 : i32
    %c0_i32_0 = arith.constant 0 : i32
    %c0_i32_1 = arith.constant 0 : i32
    return %arg0, %c0_i32, %c0_i32_0 : i32, i32, i32
  }
  func.func @transform_7(%arg0: i32) -> (i32, i32) {
    %c0_i32 = arith.constant 0 : i32
    %c0_i32_0 = arith.constant 0 : i32
    %c0_i32_1 = arith.constant 0 : i32
    return %c0_i32, %c0_i32_0 : i32, i32
  }
}

</mosaic_0001>

<bundles_post_ra>
// kernel: tpu_custom_call.1
= control target key start
LH: loop header
LB: loop body
LE: loop exit
PB: predicated region body
PF: predicated region fallthrough
CT: control target
= control target key end

     0   :  { %12 = vsyncpa [#allocation3], 0  ;;  %s1560_s24 = smov 0   ;;  %s1792_s0 = inlined_call_operand.vmem [shape: f32[16,32], index: 0, kind: input, shape index: {}]   ;;  %s1793_s1 = inlined_call_operand.vmem [shape: f32[4,1,32], index: 1, kind: input, shape index: {}]   ;;  %s1794_s2 = inlined_call_operand.vmem [shape: f32[64,16], index: 2, kind: input, shape index: {}]   ;;  %s1795_s3 = inlined_call_operand.vmem [shape: bf16[2,128,32], index: 3, kind: input, shape index: {}]   ;;  %s1796_s4 = inlined_call_operand.vmem [shape: bf16[2,32,64], index: 4, kind: input, shape index: {}]   ;;  %s1797_s5 = inlined_call_operand.vmem [shape: bf16[2,64,32], index: 5, kind: input, shape index: {}]   ;;  %s1798_s6 = inlined_call_operand.vmem [shape: f32[2,10,64], index: 6, kind: input, shape index: {}]   ;;  %s1799_s7 = inlined_call_operand.hbm [shape: f32[16,32], index: 7, kind: output, shape index: {}]  }
   0x1 LB: > { %s1566_s25 = sadd.s32 4294967295, %s1513_s24   ;;  %p1241_p0 = scmp.ge.s32.totalorder %s1513_s24, 1  ;;  %s1513_s24 = sphi %s1560_s24, %s18_s24  }
   0x2   : > { %p263_p1 = scmp.lt.s32.totalorder %s1513_s24, 3 }
   0x4   : > { %p264_p2 = pnand %p1241_p0, %p263_p1 }
   0x5   : > { %p305_p3 = scmp.lt.s32.totalorder (!%p264_p2), %s1566_s25, 1  ;;  %p1250_p4 = scmp.ne.s32.totalorder (!%p264_p2), %s1566_s25, 0 }
   0x6   : > { %267 = sbr.rel (%p264_p2) target bundleno = 2328 (0x918), region = 48 }
   0xd   : > { %s306_s26 = scalar_select %p305_p3, %s1566_s25, 1 }
   0xe   : > { %329 = sbr.rel (%p1250_p4) target bundleno = 21 (0x15), region = 52  ;;  %v330_v0 = vld [vmem:[%s1792_s0] sm:$0xff] (!%p1250_p4)  ;;  %vm332_vm0 = vcmask (!%p1250_p4), 261120   ;;  %v331_v1 = vld [vmem:[%s1792_s0 + $0x8] sm:$0xff] (!%p1250_p4) }
   0xf   : > { %s1297_s27 = sshll.u32 %s306_s26, 6  ;;  %s1298_s28 = sshll.u32 %s306_s26, 4  ;;  %333 = vst.msk [vmem:[#allocation2] sm:$0xff] (!%p1250_p4), %vm332_vm0, %v330_v0  ;;  %334 = vst.msk [vmem:[#allocation2 + $0x8] sm:$0xff] (!%p1250_p4), %vm332_vm0, %v331_v1 }
  0x10   : > { %s1575_s8 = scalar_lea.vmem %s1795_s3, %s1297_s27  ;;  %s1580_s11 = scalar_lea.vmem %s1796_s4, %s1298_s28 }
  0x11   : > { %s1299_s12 = sshll.u32 %s306_s26, 5  ;;  %s1585_s15 = scalar_lea.vmem %s1798_s6, %s1298_s28 }
  0x12   : > { %s1590_s18 = scalar_lea.vmem %s1797_s5, %s1299_s12 }
  0x15 PF: > { %v1423_v2 = vld [vmem:[%s1575_s8 + $0x10] sm:$0xff]   ;;  %v1515_v3 = vmov 0.0   ;;  %v1424_v4 = vld [vmem:[%s1575_s8] sm:$0xff]   ;;  %v1425_v5 = vld [vmem:[%s1575_s8 + $0x18] sm:$0xff]   ;;  %vm1516_vm1 = vmmov 0   ;;  %vm368_vm2 = vcmask 261120  }
  0x16   : > { %1339 = vmatprep.subr.bf16.mxu1 %v1515_v3  ;;  %1331 = vmatprep.subr.bf16.mxu0 %v1515_v3  ;;  %v1426_v6 = vld [vmem:[%s1575_s8 + $0x8] sm:$0xff]   ;;  %v1609_v7 = vld [vmem:[#allocation2] sm:$0xff]  ;;  %v578_v44 = vld [vmem:[%s1794_s2 + $0x10] sm:$0xff]  ;;  %vm664_vm3 = vcmask 130048   ;;  %vm1067_vm4 = vcmask 523264   ;;  %p1408_p5 = scmp.eq.s32.totalorder %s1566_s25, 1 }
  0x17   : > { %1340 = vmatpush3.bf16.msra.mxu1 %v1423_v2  ;;  %1343 = vmatprep.mubr.msk.bf16.mxu1 %vm1516_vm1, %v1515_v3  ;;  %v1611_v8 = vld [vmem:[#allocation2 + $0x8] sm:$0xff]  ;;  %v1251_v10 = vld [vmem:[%s1585_s15] ss:$0 sm:$0xff]  ;;  %v1255_v11 = vld [vmem:[%s1585_s15 + $0x1] ss:$0 sm:$0xff] }
  0x18   : > { %1332 = vmatpush3.bf16.msra.mxu0 %v1424_v4  ;;  %1341 = vmatprep.subr.bf16.mxu1 %v1515_v3  ;;  %v347_v9 = vpack.c.bf16 %v1611_v8, %v1609_v7  ;;  %v1627_v15 = vld [vmem:[%s1793_s1] ss:$0 sm:$0xff]  ;;  %v1632_v16 = vld [vmem:[%s1793_s1 + $0x1] ss:$0 sm:$0xff]  ;;  %v1637_v19 = vld [vmem:[%s1793_s1 + $0x2] ss:$0 sm:$0xff] }
  0x19   : > { %1333 = vmatprep.subr.bf16.mxu0 %v1515_v3  ;;  %1335 = vmatprep.mubr.msk.bf16.mxu0 %vm1516_vm1, %v1515_v3  ;;  %v1642_v20 = vld [vmem:[%s1793_s1 + $0x3] ss:$0 sm:$0xff]  ;;  %v1428_v43 = vld [vmem:[%s1575_s8 + $0x28] sm:$0xff]   ;;  %v579_v47 = vld [vmem:[%s1794_s2 + $0x18] sm:$0xff] }
  0x1a   : > { %v1427_v42 = vld [vmem:[%s1575_s8 + $0x20] sm:$0xff]   ;;  %v577_v50 = vld [vmem:[%s1794_s2 + $0x8] sm:$0xff]  ;;  %v582_v62 = vld [vmem:[%s1794_s2 + $0x30] sm:$0xff] }
  0x1b   : > { %1342 = vmatpush3.bf16.msra.mxu1 %v1425_v5  ;;  %v576_v45 = vld [vmem:[%s1794_s2] sm:$0xff]  ;;  %v581_v0 = vld [vmem:[%s1794_s2 + $0x28] sm:$0xff]  ;;  %v583_v4 = vld [vmem:[%s1794_s2 + $0x38] sm:$0xff] }
  0x1c   : > { %1334 = vmatpush3.bf16.msra.mxu0 %v1426_v6  ;;  %v580_v59 = vld [vmem:[%s1794_s2 + $0x20] sm:$0xff] }
  0x1d   : > { %1347 = vmatprep.subr.bf16.mxu0 %v1515_v3 }
  0x1e   : > { %1344 = vmatmul.mubr.msk.bf16.vlgmr.msra.gmra.mrb[0].mxu1 %vm368_vm2, %v347_v9 }
  0x1f   : > { %1336 = vmatmul.mubr.msk.bf16.vlgmr.msra.gmra.mrb[0].mxu0 %vm368_vm2, %v347_v9 }
  0x20   : > { %1351 = vmatprep.mubr.msk.bf16.mxu0 %vm1516_vm1, %v1515_v3  ;;  %1348 = vmatpush3.bf16.msra.mxu0 %v1427_v42 }
  0x21   : > { %1349 = vmatprep.subr.bf16.mxu0 %v1515_v3 }
  0x24   : > { %1350 = vmatpush3.bf16.msra.mxu0 %v1428_v43 }
  0x27   : > { %1352 = vmatmul.mubr.msk.bf16.vlgmr.msra.gmra.mrb[4].mxu0 %vm368_vm2, %v347_v9 }
  0xf1   : > { %v467_v12 = vpop.f32.mrb[0].mxu1 }
  0xf2   : > { %v1345_v13 = vpop.f32.mrb[1].mxu1  ;;  %v406_v14 = vpop.f32.mrb[0].mxu0  ;;  %v468_v22 = vadd.f32 %v1255_v11, %v467_v12 }
  0xf3   : > { %v470_v17 = vpop.f32.mrb[2].mxu1  ;;  %v407_v18 = vadd.f32 %v1251_v10, %v406_v14  ;;  %v1337_v21 = vpop.f32.mrb[1].mxu0 }
  0xf4   : > { %v471_v23 = vadd.f32 %v1255_v11, %v470_v17  ;;  %v1346_v24 = vpop.f32.mrb[3].mxu1  ;;  %v409_v25 = vpop.f32.mrb[2].mxu0 }
  0xf5   : > { %v563_v26 = vmul.f32 %v1627_v15, %v407_v18  ;;  %v565_v27 = vmul.f32 %v1632_v16, %v407_v18  ;;  %v1338_v28 = vpop.f32.mrb[3].mxu0  ;;  %v567_v30 = vmul.f32 %v1637_v19, %v407_v18  ;;  %v569_v31 = vmul.f32 %v1642_v20, %v407_v18 }
  0xf6   : > { %v575_v29 = vpack.c.bf16 %v471_v23, %v468_v22  ;;  %v410_v32 = vadd.f32 %v1251_v10, %v409_v25 }
  0xf8   : > { %v564_v33 = vmul.f32 %v1627_v15, %v410_v32  ;;  %v566_v34 = vmul.f32 %v1632_v16, %v410_v32  ;;  %v568_v35 = vmul.f32 %v1637_v19, %v410_v32  ;;  %v570_v36 = vmul.f32 %v1642_v20, %v410_v32  ;;  %1403 = vmatprep.subr.msk.bf16.mxu1 %vm368_vm2, %v575_v29 }
  0xf9   : > { %v597_v37 = vsel %vm368_vm2, %v575_v29, 0 }
  0xfa   : > { %v572_v38 = vpack.c.bf16 %v566_v34, %v565_v27  ;;  %1356 = vmatpush3.bf16.xpose.msra.mxu1 %v597_v37  ;;  %v571_v39 = vpack.c.bf16 %v564_v33, %v563_v26  ;;  %v573_v40 = vpack.c.bf16 %v568_v35, %v567_v30  ;;  %v574_v41 = vpack.c.bf16 %v570_v36, %v569_v31 }
  0xfb   : > { %1375 = vmatprep.subr.bf16.mxu1 %v1515_v3 }
  0xfc   : > { %1357 = vmatprep.mubr.msk.bf16.mxu1 %vm368_vm2, %v571_v39 }
 0x101   : > { %1358 = vmatmul.mubr.msk.bf16.vlgmr.msra.gmra.mrb[4].mxu1 %vm368_vm2, %v572_v38 }
 0x102   : > { %1361 = vmatprep.mubr.msk.bf16.mxu1 %vm368_vm2, %v573_v40 }
 0x109   : > { %1362 = vmatmul.mubr.msk.bf16.gmra.mrb[8].mxu1 %vm368_vm2, %v574_v41 }
 0x10a   : > { %1379 = vmatprep.mubr.msk.bf16.mxu1 %vm1516_vm1, %v1515_v3 }
 0x1d4   : > { %v1359_v46 = vpop.f32.mrb[4].mxu1 }
 0x1d5   : > { %v642_v48 = vadd.f32 %v1359_v46, %v578_v44  ;;  %v633_v49 = vpop.f32.mrb[5].mxu1 }
 0x1d6   : > { %v634_v51 = vadd.f32 %v633_v49, %v576_v45  ;;  %v1360_v52 = vpop.f32.mrb[6].mxu1 }
 0x1d7   : > { %v645_v53 = vadd.f32 %v1360_v52, %v579_v47  ;;  %v636_v54 = vpop.f32.mrb[7].mxu1  ;;  %v671_v55 = vsel %vm664_vm3, %v642_v48, -inf }
 0x1d8   : > { %v637_v56 = vadd.f32 %v636_v54, %v577_v50  ;;  %672 = vmax.xlane.f32.xlu1 %v671_v55  ;;  %v665_v57 = vsel %vm664_vm3, %v634_v51, -inf }
 0x1d9   : > { %666 = vmax.xlane.f32.xlu0 %v665_v57  ;;  %v674_v58 = vsel %vm664_vm3, %v645_v53, -inf }
 0x1da   : > { %v668_v61 = vsel %vm664_vm3, %v637_v56, -inf }
 0x1dc   : > { %675 = vmax.xlane.f32.xlu1 %v674_v58  ;;  %v1363_v60 = vpop.f32.mrb[8].mxu1 }
 0x1dd   : > { %v649_v63 = vpop.f32.mrb[9].mxu1  ;;  %669 = vmax.xlane.f32.xlu0 %v668_v61  ;;  %v658_v6 = vadd.f32 %v1363_v60, %v582_v62  ;;  %v1259_v61 = vld [vmem:[%s1585_s15 + $0x2] ss:$0 sm:$0xff] }
 0x1de   : > { %v650_v1 = vadd.f32 %v649_v63, %v580_v59  ;;  %v1364_v2 = vpop.f32.mrb[10].mxu1  ;;  %v528_v59 = vpop.f32.mrb[4].mxu0 }
 0x1df   : > { %v652_v5 = vpop.f32.mrb[11].mxu1  ;;  %v661_v11 = vadd.f32 %v1364_v2, %v583_v4  ;;  %v683_v13 = vsel %vm664_vm3, %v658_v6, -inf  ;;  %v1353_v60 = vpop.f32.mrb[5].mxu0  ;;  %v529_v63 = vadd.f32 %v1259_v61, %v528_v59 }
 0x1e0   : > { %v653_v9 = vadd.f32 %v652_v5, %v581_v0  ;;  %v677_v10 = vsel %vm664_vm3, %v650_v1, -inf  ;;  %v531_v62 = vpop.f32.mrb[6].mxu0 }
 0x1e1   : > { %678 = vmax.xlane.f32.xlu0 %v677_v10  ;;  %v686_v14 = vsel %vm664_vm3, %v661_v11, -inf  ;;  %v532_v0 = vadd.f32 %v1259_v61, %v531_v62 }
 0x1e2   : > { %v680_v12 = vsel %vm664_vm3, %v653_v9, -inf }
 0x1e3   : > { %681 = vmax.xlane.f32.xlu1 %v680_v12  ;;  %v757_v2 = vpack.c.bf16 %v532_v0, %v529_v63 }
 0x1e5   : > { %684 = vmax.xlane.f32.xlu0 %v683_v13  ;;  %1365 = vmatprep.subr.bf16.mxu0 %v757_v2 }
 0x1e6   : > { %1366 = vmatpush3.bf16.msra.mxu0 %v757_v2 }
 0x1e7   : > { %687 = vmax.xlane.f32.xlu1 %v686_v14  ;;  %1383 = vmatprep.subr.bf16.mxu0 %v1515_v3 }
 0x265   : > { %v673_v17 = vpop.xlane.xlu1 %672 }
 0x266   : > { %v691_v18 = vsub.f32 %v642_v48, %v673_v17  ;;  %v667_v21 = vpop.xlane.xlu0 %666 }
 0x267   : > { %v689_v22 = vsub.f32 %v634_v51, %v667_v21 }
 0x268   : > { %v701_v23 = vmul.f32 1.442695, %v691_v18 }
 0x269   : > { %v697_v24 = vmul.f32 1.442695, %v689_v22  ;;  %v676_v25 = vpop.xlane.xlu1 %675 }
 0x26a   : > { %v692_v26 = vsub.f32 %v645_v53, %v676_v25  ;;  %v670_v27 = vpop.xlane.xlu0 %669 }
 0x26b   : > { %1437 = vpow2.f32 %v697_v24  ;;  %v690_v28 = vsub.f32 %v637_v56, %v670_v27 }
 0x26c   : > { %1439 = vpow2.f32 %v701_v23  ;;  %v703_v29 = vmul.f32 1.442695, %v692_v26 }
 0x26d   : > { %v699_v30 = vmul.f32 1.442695, %v690_v28 }
 0x26e   : > { %v679_v31 = vpop.xlane.xlu0 %678 }
 0x26f   : > { %1441 = vpow2.f32 %v699_v30  ;;  %v693_v32 = vsub.f32 %v650_v1, %v679_v31  ;;  %v1354_v1 = vpop.f32.mrb[7].mxu0 }
 0x270   : > { %v682_v33 = vpop.xlane.xlu1 %681  ;;  %1443 = vpow2.f32 %v703_v29 }
 0x271   : > { %v705_v34 = vmul.f32 1.442695, %v693_v32  ;;  %v694_v35 = vsub.f32 %v653_v9, %v682_v33 }
 0x272   : > { %v685_v36 = vpop.xlane.xlu0 %684 }
 0x273   : > { %1445 = vpow2.f32 %v705_v34  ;;  %v707_v37 = vmul.f32 1.442695, %v694_v35  ;;  %v695_v38 = vsub.f32 %v658_v6, %v685_v36 }
 0x274   : > { %v688_v39 = vpop.xlane.xlu1 %687 }
 0x275   : > { %v1438_v40 = vpop.eup %1437  ;;  %1447 = vpow2.f32 %v707_v37  ;;  %v709_v41 = vmul.f32 1.442695, %v695_v38  ;;  %v696_v42 = vsub.f32 %v661_v11, %v688_v39  ;;  %v1429_v38 = vld [vmem:[%s1575_s8 + $0x30] sm:$0xff]   ;;  %v1430_v39 = vld [vmem:[%s1575_s8 + $0x38] sm:$0xff]   ;;  %s1517_s8 = smov [#allocation2]  }
 0x276   : > { %v713_v43 = vsel %vm664_vm3, %v1438_v40, 0.0  ;;  %v1440_v44 = vpop.eup %1439  ;;  %1376 = vmatpush3.bf16.msra.mxu1 %v1429_v38 }
 0x277   : > { %1449 = vpow2.f32 %v709_v41  ;;  %v711_v45 = vmul.f32 1.442695, %v696_v42  ;;  %714 = vadd.xlane.f32.xlu0 %v713_v43  ;;  %v719_v47 = vsel %vm664_vm3, %v1440_v44, 0.0  ;;  %1377 = vmatprep.subr.bf16.mxu1 %v1515_v3 }
 0x279   : > { %v1442_v46 = vpop.eup %1441  ;;  %1451 = vpow2.f32 %v711_v45 }
 0x27a   : > { %v716_v48 = vsel %vm664_vm3, %v1442_v46, 0.0  ;;  %v1444_v49 = vpop.eup %1443  ;;  %1378 = vmatpush3.bf16.msra.mxu1 %v1430_v39 }
 0x27b   : > { %720 = vadd.xlane.f32.xlu0 %v719_v47  ;;  %717 = vadd.xlane.f32.xlu1 %v716_v48  ;;  %v722_v51 = vsel %vm664_vm3, %v1444_v49, 0.0 }
 0x27c   : > { %1391 = vmatprep.subr.bf16.mxu1 %v1515_v3 }
 0x27d   : > { %v1446_v50 = vpop.eup %1445 }
 0x27e   : > { %v725_v52 = vsel %vm664_vm3, %v1446_v50, 0.0 }
 0x27f   : > { %v1448_v53 = vpop.eup %1447  ;;  %723 = vadd.xlane.f32.xlu1 %v722_v51  ;;  %726 = vadd.xlane.f32.xlu0 %v725_v52 }
 0x280   : > { %v728_v55 = vsel %vm664_vm3, %v1448_v53, 0.0 }
 0x281   : > { %v1450_v54 = vpop.eup %1449 }
 0x282   : > { %v731_v56 = vsel %vm664_vm3, %v1450_v54, 0.0 }
 0x283   : > { %v1452_v57 = vpop.eup %1451  ;;  %729 = vadd.xlane.f32.xlu1 %v728_v55  ;;  %732 = vadd.xlane.f32.xlu0 %v731_v56 }
 0x284   : > { %v734_v58 = vsel %vm664_vm3, %v1452_v57, 0.0 }
 0x287   : > { %735 = vadd.xlane.f32.xlu1 %v734_v58 }
 0x304   : > { %v715_v4 = vpop.xlane.xlu0 %714 }
 0x305   : > { %1453 = vrcp.f32 %v715_v4 }
 0x308   : > { %v718_v5 = vpop.xlane.xlu1 %717  ;;  %v721_v6 = vpop.xlane.xlu0 %720 }
 0x309   : > { %1455 = vrcp.f32 %v718_v5 }
 0x30a   : > { %1457 = vrcp.f32 %v721_v6  ;;  %v1275_v6 = vld [vmem:[%s1585_s15 + $0x3] ss:$0 sm:$0xff] }
 0x30c   : > { %v724_v9 = vpop.xlane.xlu1 %723  ;;  %v727_v10 = vpop.xlane.xlu0 %726 }
 0x30d   : > { %1459 = vrcp.f32 %v724_v9 }
 0x30e   : > { %1461 = vrcp.f32 %v727_v10 }
 0x30f   : > { %v1454_v13 = vpop.eup %1453 }
 0x310   : > { %v730_v11 = vpop.xlane.xlu1 %729  ;;  %v733_v12 = vpop.xlane.xlu0 %732  ;;  %v745_v18 = vmul.f32 %v1454_v13, %v1438_v40 }
 0x311   : > { %1463 = vrcp.f32 %v730_v11 }
 0x312   : > { %1465 = vrcp.f32 %v733_v12 }
 0x313   : > { %v1456_v14 = vpop.eup %1455 }
 0x314   : > { %v736_v17 = vpop.xlane.xlu1 %735  ;;  %v746_v21 = vmul.f32 %v1456_v14, %v1442_v46  ;;  %v1458_v22 = vpop.eup %1457 }
 0x315   : > { %1467 = vrcp.f32 %v736_v17  ;;  %v747_v25 = vmul.f32 %v1458_v22, %v1440_v44 }
 0x316   : > { %v753_v23 = vpack.c.bf16 %v746_v21, %v745_v18 }
 0x317   : > { %v1460_v24 = vpop.eup %1459 }
 0x318   : > { %v748_v26 = vmul.f32 %v1460_v24, %v1444_v49  ;;  %1367 = vmatprep.mubr.msk.bf16.mxu0 %vm664_vm3, %v753_v23  ;;  %v1462_v27 = vpop.eup %1461 }
 0x319   : > { %v749_v30 = vmul.f32 %v1462_v27, %v1446_v50 }
 0x31a   : > { %v754_v28 = vpack.c.bf16 %v748_v26, %v747_v25 }
 0x31b   : > { %v1464_v29 = vpop.eup %1463 }
 0x31c   : > { %1368 = vmatmul.mubr.msk.bf16.vlgmr.msra.gmra.mrb[8].mxu0 %vm664_vm3, %v754_v28  ;;  %v750_v31 = vmul.f32 %v1464_v29, %v1448_v53  ;;  %v1466_v32 = vpop.eup %1465  ;;  %v1431_v29 = vld [vmem:[%s1580_s11] sm:$0xff]  }
 0x31d   : > { %v751_v35 = vmul.f32 %v1466_v32, %v1450_v54  ;;  %1384 = vmatpush3.bf16.msra.mxu0 %v1431_v29  ;;  %v1434_v32 = vld [vmem:[%s1590_s18 + $0x8] sm:$0xff]  }
 0x31e   : > { %v755_v33 = vpack.c.bf16 %v750_v31, %v749_v30  ;;  %1385 = vmatprep.subr.bf16.mxu0 %v1515_v3  ;;  %v1432_v30 = vld [vmem:[%s1580_s11 + $0x8] sm:$0xff]   ;;  %v1433_v31 = vld [vmem:[%s1590_s18] sm:$0xff]   ;;  %s1160_s11 = sshll.u32 %s1517_s8, 4  ;;  %s1161_s11 = int_to_ptr.vmem [resolvable:$true] %s1160_s11 }
 0x31f   : > { %v1468_v34 = vpop.eup %1467  ;;  %v1292_v29 = vld [vmem:[%s1585_s15 + $0x9] ss:$0 sm:$0xff]  ;;  %p1484_p9 = scmp.lt.s32.totalorder %s1161_s11, %s1161_s11 }
 0x320   : > { %1371 = vmatprep.mubr.msk.bf16.mxu0 %vm664_vm3, %v755_v33  ;;  %v752_v36 = vmul.f32 %v1468_v34, %v1452_v57 }
 0x321   : > { %1386 = vmatpush3.bf16.msra.mxu0 %v1432_v30 }
 0x322   : > { %v756_v37 = vpack.c.bf16 %v752_v36, %v751_v35 }
 0x324   : > { %1372 = vmatmul.mubr.msk.bf16.gmra.mrb[12].mxu0 %vm664_vm3, %v756_v37 }
 0x325   : > { %1387 = vmatprep.mubr.msk.bf16.mxu0 %vm1516_vm1, %v1515_v3 }
 0x3ef   : > { %v1369_v40 = vpop.f32.mrb[8].mxu0 }
 0x3f0   : > { %v837_v41 = vmul.f32 %v1369_v40, %v1632_v16  ;;  %v804_v42 = vpop.f32.mrb[9].mxu0  ;;  %v1279_v40 = vld [vmem:[%s1585_s15 + $0x6] ss:$0 sm:$0xff] }
 0x3f1   : > { %v835_v43 = vmul.f32 %v1627_v15, %v804_v42  ;;  %v1370_v44 = vpop.f32.mrb[10].mxu0 }
 0x3f2   : > { %v844_v45 = vsel %vm368_vm2, %v837_v41, 0.0  ;;  %v838_v46 = vmul.f32 %v1370_v44, %v1632_v16  ;;  %v807_v47 = vpop.f32.mrb[11].mxu0 }
 0x3f3   : > { %v843_v48 = vsel %vm368_vm2, %v835_v43, 0.0  ;;  %v836_v49 = vmul.f32 %v1627_v15, %v807_v47 }
 0x3f4   : > { %v845_v50 = vadd.f32 %v844_v45, %v843_v48  ;;  %v851_v51 = vsel %vm368_vm2, %v838_v46, 0.0  ;;  %v1280_v45 = vld [vmem:[%s1585_s15 + $0x7] ss:$0 sm:$0xff] }
 0x3f5   : > { %v850_v52 = vsel %vm368_vm2, %v836_v49, 0.0 }
 0x3f6   : > { %v852_v53 = vadd.f32 %v851_v51, %v850_v52  ;;  %v1436_v51 = vld [vmem:[%s1590_s18 + $0x18] sm:$0xff]   ;;  %v1281_v52 = vld [vmem:[%s1585_s15 + $0x4] ss:$0 sm:$0xff] }
 0x3f7   : > { %v1373_v54 = vpop.f32.mrb[12].mxu0 }
 0x3f8   : > { %v820_v55 = vpop.f32.mrb[13].mxu0  ;;  %v841_v56 = vmul.f32 %v1373_v54, %v1642_v20 }
 0x3f9   : > { %v839_v57 = vmul.f32 %v1637_v19, %v820_v55  ;;  %v1374_v58 = vpop.f32.mrb[14].mxu0 }
 0x3fa   : > { %v823_v16 = vpop.f32.mrb[15].mxu0  ;;  %v842_v60 = vmul.f32 %v1374_v58, %v1642_v20  ;;  %v848_v62 = vsel %vm368_vm2, %v841_v56, 0.0 }
 0x3fb   : > { %v846_v59 = vsel %vm368_vm2, %v839_v57, 0.0  ;;  %v840_v15 = vmul.f32 %v1637_v19, %v823_v16 }
 0x3fc   : > { %v847_v61 = vadd.f32 %v846_v59, %v845_v50  ;;  %v855_v2 = vsel %vm368_vm2, %v842_v60, 0.0  ;;  %v1435_v50 = vld [vmem:[%s1590_s18 + $0x10] sm:$0xff]   ;;  %s1477_s18 = scalar_lea.vmem %s1161_s11, 256 }
 0x3fd   : > { %v853_v63 = vsel %vm368_vm2, %v840_v15, 0.0  ;;  %v1285_v15 = vld [vmem:[%s1585_s15 + $0x5] ss:$0 sm:$0xff]  ;;  %p1478_p6 = scmp.ne.s32.totalorder %s1161_s11, %s1477_s18  ;;  %p1485_p10 = scmp.lt.s32.totalorder %s1477_s18, %s1477_s18 }
 0x3fe   : > { %v849_v0 = vadd.f32 %v848_v62, %v847_v61  ;;  %v854_v1 = vadd.f32 %v853_v63, %v852_v53 }
 0x3ff   : > { %p1479_p7 = pnand %p1478_p6, %p1408_p5  ;;  %p1486_p11 = por %p1485_p10, %p1484_p9 }
 0x400   : > { %v856_v4 = vadd.f32 %v855_v2, %v854_v1 }
 0x401   : > { %p1480_p8 = pneg %p1479_p7 }
 0x402   : > { %v857_v5 = vpack.c.bf16 %v856_v4, %v849_v0 }
 0x403   : > { %p1487_p12 = pnand %p1486_p11, %p1480_p8 }
 0x404   : > { %1380 = vmatmul.mubr.msk.bf16.vlgmr.msra.gmra.mrb[12].mxu1 %vm368_vm2, %v857_v5 }
 0x405   : > { %1399 = vmatprep.mubr.msk.bf16.mxu1 %vm1516_vm1, %v1515_v3  ;;  %1392 = vmatpush3.bf16.msra.mxu1 %v1433_v31 }
 0x406   : > { %1393 = vmatprep.subr.bf16.mxu1 %v1515_v3 }
 0x409   : > { %1394 = vmatpush3.bf16.msra.mxu1 %v1434_v32 }
 0x40a   : > { %1395 = vmatprep.subr.bf16.mxu1 %v1515_v3 }
 0x40d   : > { %1396 = vmatpush3.bf16.msra.mxu1 %v1435_v50 }
 0x40e   : > { %1397 = vmatprep.subr.bf16.mxu1 %v1515_v3 }
 0x411   : > { %1398 = vmatpush3.bf16.msra.mxu1 %v1436_v51 }
 0x4d7   : > { %v915_v20 = vpop.f32.mrb[12].mxu1 }
 0x4d8   : > { %v916_v9 = vadd.f32 %v1275_v6, %v915_v20  ;;  %v1381_v19 = vpop.f32.mrb[13].mxu1 }
 0x4d9   : > { %v918_v10 = vpop.f32.mrb[14].mxu1 }
 0x4da   : > { %v919_v11 = vadd.f32 %v1275_v6, %v918_v10  ;;  %v1382_v12 = vpop.f32.mrb[15].mxu1  ;;  %v922_v13 = vadd.f32 %v916_v9, %v1609_v7 }
 0x4dc   : > { %v924_v14 = vsel %vm368_vm2, %v922_v13, 0.0  ;;  %v923_v17 = vadd.f32 %v919_v11, %v1611_v8 }
 0x4dd   : > { %925 = vadd.xlane.f32.xlu0 %v924_v14 }
 0x4de   : > { %v927_v18 = vsel %vm368_vm2, %v923_v17, 0.0 }
 0x4df   : > { %928 = vadd.xlane.f32.xlu1 %v927_v18 }
 0x56a   : > { %v926_v21 = vpop.xlane.xlu0 %925 }
 0x56b   : > { %v931_v22 = vmul.f32 0.03125, %v926_v21 }
 0x56c   : > { %v929_v23 = vpop.xlane.xlu1 %928 }
 0x56d   : > { %v933_v24 = vsub.f32 %v922_v13, %v931_v22  ;;  %v932_v25 = vmul.f32 0.03125, %v929_v23 }
 0x56f   : > { %v934_v26 = vsub.f32 %v923_v17, %v932_v25  ;;  %v935_v27 = vmul.f32 %v933_v24, %v933_v24 }
 0x571   : > { %v937_v7 = vsel %vm368_vm2, %v935_v27, 0.0  ;;  %v936_v28 = vmul.f32 %v934_v26, %v934_v26 }
 0x572   : > { %938 = vadd.xlane.f32.xlu0 %v937_v7  ;;  %v1291_v7 = vld [vmem:[%s1585_s15 + $0x8] ss:$0 sm:$0xff] }
 0x573   : > { %v940_v8 = vsel %vm368_vm2, %v936_v28, 0.0 }
 0x574   : > { %941 = vadd.xlane.f32.xlu1 %v940_v8 }
 0x5ff   : > { %v939_v33 = vpop.xlane.xlu0 %938 }
 0x600   : > { %v943_v34 = vmul.f32 0.03125, %v939_v33 }
 0x601   : > { %v942_v35 = vpop.xlane.xlu1 %941 }
 0x602   : > { %v945_v36 = vadd.f32 1e-05, %v943_v34  ;;  %v944_v37 = vmul.f32 0.03125, %v942_v35 }
 0x604   : > { %1469 = vrsqrt.f32 %v945_v36  ;;  %v946_v38 = vadd.f32 1e-05, %v944_v37 }
 0x606   : > { %1471 = vrsqrt.f32 %v946_v38 }
 0x60e   : > { %v1470_v39 = vpop.eup %1469 }
 0x60f   : > { %v949_v41 = vmul.f32 %v1470_v39, %v933_v24 }
 0x610   : > { %v1472_v42 = vpop.eup %1471 }
 0x611   : > { %v955_v43 = vmul.f32 %v1279_v40, %v949_v41  ;;  %v950_v44 = vmul.f32 %v1472_v42, %v934_v26 }
 0x613   : > { %v956_v46 = vmul.f32 %v1279_v40, %v950_v44  ;;  %v961_v47 = vadd.f32 %v1280_v45, %v955_v43 }
 0x615   : > { %v962_v48 = vadd.f32 %v1280_v45, %v956_v46 }
 0x617   : > { %v963_v49 = vpack.c.bf16 %v962_v48, %v961_v47 }
 0x619   : > { %1388 = vmatmul.mubr.msk.bf16.vlgmr.msra.gmra.mrb[16].mxu0 %vm368_vm2, %v963_v49 }
 0x6ec   : > { %v1021_v53 = vpop.f32.mrb[16].mxu0 }
 0x6ed   : > { %v1022_v54 = vadd.f32 %v1281_v52, %v1021_v53  ;;  %v1389_v55 = vpop.f32.mrb[17].mxu0 }
 0x6ee   : > { %v1024_v56 = vpop.f32.mrb[18].mxu0 }
 0x6ef   : > { %v1025_v57 = vadd.f32 %v1281_v52, %v1024_v56  ;;  %v1390_v58 = vpop.f32.mrb[19].mxu0  ;;  %v1028_v16 = vmax.f32 %v1022_v54, 0.0 }
 0x6f1   : > { %v1029_v59 = vmax.f32 %v1025_v57, 0.0 }
 0x6f3   : > { %v1030_v60 = vpack.c.bf16 %v1029_v59, %v1028_v16 }
 0x6f5   : > { %1400 = vmatmul.mubr.msk.bf16.vlgmr.msra.gmra.mrb[16].mxu1 %vm1067_vm4, %v1030_v60 }
 0x7c8   : > { %v1105_v61 = vpop.f32.mrb[16].mxu1 }
 0x7c9   : > { %v1106_v62 = vadd.f32 %v1285_v15, %v1105_v61  ;;  %v1401_v63 = vpop.f32.mrb[17].mxu1 }
 0x7ca   : > { %v1108_v0 = vpop.f32.mrb[18].mxu1 }
 0x7cb   : > { %v1109_v3 = vadd.f32 %v1285_v15, %v1108_v0  ;;  %v1402_v1 = vpop.f32.mrb[19].mxu1  ;;  %v1112_v2 = vadd.f32 %v1106_v62, %v961_v47 }
 0x7cd   : > { %v1114_v4 = vsel %vm368_vm2, %v1112_v2, 0.0  ;;  %v1113_v5 = vadd.f32 %v1109_v3, %v962_v48 }
 0x7ce   : > { %1115 = vadd.xlane.f32.xlu0 %v1114_v4 }
 0x7cf   : > { %v1117_v6 = vsel %vm368_vm2, %v1113_v5, 0.0 }
 0x7d0   : > { %1118 = vadd.xlane.f32.xlu1 %v1117_v6 }
 0x85b   : > { %v1116_v20 = vpop.xlane.xlu0 %1115 }
 0x85c   : > { %v1120_v9 = vmul.f32 0.03125, %v1116_v20 }
 0x85d   : > { %v1119_v19 = vpop.xlane.xlu1 %1118 }
 0x85e   : > { %v1122_v10 = vsub.f32 %v1112_v2, %v1120_v9  ;;  %v1121_v11 = vmul.f32 0.03125, %v1119_v19 }
 0x860   : > { %v1123_v12 = vsub.f32 %v1113_v5, %v1121_v11  ;;  %v1124_v13 = vmul.f32 %v1122_v10, %v1122_v10 }
 0x862   : > { %v1126_v14 = vsel %vm368_vm2, %v1124_v13, 0.0  ;;  %v1125_v17 = vmul.f32 %v1123_v12, %v1123_v12 }
 0x863   : > { %1127 = vadd.xlane.f32.xlu0 %v1126_v14 }
 0x864   : > { %v1129_v18 = vsel %vm368_vm2, %v1125_v17, 0.0 }
 0x865   : > { %1130 = vadd.xlane.f32.xlu1 %v1129_v18 }
 0x8f0   : > { %v1128_v21 = vpop.xlane.xlu0 %1127 }
 0x8f1   : > { %v1132_v22 = vmul.f32 0.03125, %v1128_v21 }
 0x8f2   : > { %v1131_v23 = vpop.xlane.xlu1 %1130 }
 0x8f3   : > { %v1134_v24 = vadd.f32 1e-05, %v1132_v22  ;;  %v1133_v25 = vmul.f32 0.03125, %v1131_v23 }
 0x8f5   : > { %1473 = vrsqrt.f32 %v1134_v24  ;;  %v1135_v26 = vadd.f32 1e-05, %v1133_v25 }
 0x8f7   : > { %1475 = vrsqrt.f32 %v1135_v26 }
 0x8ff   : > { %v1474_v27 = vpop.eup %1473 }
 0x900   : > { %v1138_v28 = vmul.f32 %v1474_v27, %v1122_v10 }
 0x901   : > { %v1476_v8 = vpop.eup %1475 }
 0x902   : > { %v1144_v30 = vmul.f32 %v1291_v7, %v1138_v28  ;;  %v1139_v31 = vmul.f32 %v1476_v8, %v1123_v12 }
 0x904   : > { %v1145_v32 = vmul.f32 %v1291_v7, %v1139_v31  ;;  %v1150_v33 = vadd.f32 %v1292_v29, %v1144_v30 }
 0x906   : > { %v1151_v34 = vadd.f32 %v1292_v29, %v1145_v32  ;;  %1152 = vst.msk [vmem:[#allocation2] sm:$0xff] %vm368_vm2, %v1150_v33 }
 0x908   : > { %1153 = vst.msk [vmem:[#allocation2 + $0x8] sm:$0xff] %vm368_vm2, %v1151_v34 }
 0x909   : > { %1490 = shalt.err (!%p1487_p12)
}
 0x90a   : > { %s1491_s12 = scalar_lea.hbm %s1799_s7, 256 }
 0x90b   : > { %p1492_p13 = scmp.ne.s32.totalorder %s1799_s7, %s1491_s12  ;;  %p1497_p2 = scmp.lt.u32.totalorder %s1491_s12, %s1799_s7 }
 0x90d   : > { %p1493_p0 = pnand %p1492_p13, %p1408_p5 }
 0x90f   : > { %p1494_p1 = pneg %p1493_p0 }
 0x911   : > { %p1499_p3 = pnand %p1497_p2, %p1494_p1 }
 0x913   : > { %1502 = shalt.err (!%p1499_p3)
}
 0x914   : > { %s1518_s19 = smov 128   ;;  %s1519_s20 = smov 8  }
 0x915   : > { %1405 = dma.vmem_to_hbm [thread:$0]  (%p1408_p5), %s1161_s11, 256, %s1799_s7, [#allocation3], %s1518_s19, %s1518_s19, %s1519_s20  }
 0x916   : > { %1508 = dma.done.wait (%p1408_p5), [#allocation3], 256  }
 0x917   : > { %1510 = vsyncadd (%p1408_p5), [#allocation3], 4294967040 }
 0x918 PF: > { %s18_s24 = sadd.s32 1, %s1513_s24  }
 0x919   : > { %p15_p4 = scmp.ge.s32.totalorder %s18_s24, 4  }
 0x91b   :  { %17 = sbr.rel (!%p15_p4) target bundleno = 1 (0x1), region = 88 }
 0x922   :  { %1176 = vsyncpa [#allocation3], 1 }
 0x923   :  { %1178 = vsyncpa [#allocation3 + $0x1], 1 }

</bundles_post_ra>
